<compile_context>
chip_gen: v6e
topology: v6e:2x2x1
jax: 0.10.0
libtpu: 0.0.40
codegen_flags: <defaults>
</compile_context>

<pallas_src>
import jax
import jax.numpy as jnp
from jax.experimental import pallas as pl
from jax.experimental.pallas import tpu as pltpu

EPS = 0.5  # BatchNorm2d(3, 0.5) -> eps = 0.5


def conv_bn_square_kernel(x_ref, p_ref, o_ref):
    # x_ref: (N, Cin, S)      zero-padded pixels, spatial flattened on lanes
    # p_ref: (Cin+3, Cout, 1) rows: w[:,0], ..., w[:,Cin-1], bias, gamma, beta
    # o_ref: (N, Cout, S)
    n, cin, s = x_ref.shape
    inv_m = 1.0 / float(n * s)

    # --- 1x1 conv as Cin broadcast FMAs on the VPU (K=3 is too small for MXU) --
    # (1, Cout, 1) * (N, 1, S) -> (N, Cout, S); padded pixels give exactly bias.
    v1 = p_ref[cin][None, :, :]                               # bias (1, Cout, 1)
    for c in range(cin):                                      # static unroll, Cin=3
        xc = x_ref[:, c:c + 1, :]                             # (N, 1, S) ref load
        v1 = v1 + p_ref[c][None, :, :] * xc                   # (N, Cout, S)

    # --- BatchNorm2d training mode: one-pass biased batch statistics ---------
    # sum and sum-of-squares in the same traversal; lane reduce (XLU) then the
    # tiny batch-axis reduce; var = E[x^2] - mean^2 (eps=0.5 makes this safe).
    s1 = jnp.sum(v1, axis=2, keepdims=True)                   # (N, Cout, 1)
    s2 = jnp.sum(v1 * v1, axis=2, keepdims=True)              # (N, Cout, 1)
    mean = jnp.sum(s1, axis=0, keepdims=True) * inv_m         # (1, Cout, 1)
    var = jnp.sum(s2, axis=0, keepdims=True) * inv_m - mean * mean
    var = jnp.maximum(var, 0.0)                               # cheap insurance

    gamma = p_ref[cin + 1][None, :, :]
    beta = p_ref[cin + 2][None, :, :]
    scale = gamma * jax.lax.rsqrt(var + EPS)                  # folded affine (EUP)
    shift = beta - mean * scale

    y = v1 * scale + shift                                    # == bn(v1) == v2 == v3
    o_ref[...] = y * y                                        # lane-dense store


def pack_params(conv_w, conv_b, bn_gamma, bn_beta):
    """Pack all per-channel parameters once, at init time (NOT per forward):
       rows 0..Cin-1 : w[:, c]   (Cout,)
       row  Cin      : conv bias
       row  Cin+1    : BN gamma
       row  Cin+2    : BN beta
    Returns (Cin+3, Cout, 1) float32."""
    Cout, Cin = conv_w.shape[0], conv_w.shape[1]
    w2 = conv_w.reshape(Cout, Cin).astype(jnp.float32)        # (Cout, Cin)
    return jnp.concatenate(
        [w2.T,
         conv_b.reshape(1, Cout).astype(jnp.float32),
         bn_gamma.reshape(1, Cout).astype(jnp.float32),
         bn_beta.reshape(1, Cout).astype(jnp.float32)],
        axis=0)[:, :, None]                                   # (Cin+3, Cout, 1)


@jax.jit
def model_forward(x_nchw, params):
    """x_nchw: (N, Cin, H, W) float32; params from pack_params.
    Returns (N, Cout, H+2, W+2) float32."""
    N, Cin, H, W = x_nchw.shape
    Cout = params.shape[1]
    Hp, Wp = H + 2, W + 2
    S = Hp * Wp

    # padding=1 on a 1x1 conv: zero-pad spatially; padded pixels -> conv = bias,
    # and they are part of the BN statistics, matching PyTorch exactly.
    # ~8 KB pad, fused under jit next to the pallas_call.
    xp = jnp.pad(x_nchw.astype(jnp.float32), ((0, 0), (0, 0), (1, 1), (1, 1)))
    x3 = xp.reshape(N, Cin, S)                                # pure reshape, no transpose

    flops = 2 * N * Cout * S * (Cin + 3)                      # conv FMAs + normalize/square
    bytes_accessed = 4 * (N * Cin * S + params.size + N * Cout * S)

    out3 = pl.pallas_call(
        conv_bn_square_kernel,
        out_shape=jax.ShapeDtypeStruct((N, Cout, S), jnp.float32),
        grid=(1,),
        in_specs=[
            pl.BlockSpec((N, Cin, S), lambda i: (0, 0, 0)),
            pl.BlockSpec((Cin + 3, Cout, 1), lambda i: (0, 0, 0)),
        ],
        out_specs=pl.BlockSpec((N, Cout, S), lambda i: (0, 0, 0)),
        compiler_params=pltpu.CompilerParams(
            dimension_semantics=("arbitrary",)),
        cost_estimate=pl.CostEstimate(
            flops=flops, transcendentals=Cout, bytes_accessed=bytes_accessed),
    )(x3, params)

    # zero-cost reshape straight back to NCHW (no transpose).
    return out3.reshape(N, Cout, Hp, Wp)


def _reference(x_nchw, conv_w, conv_b, bn_gamma, bn_beta):
    # pure-JAX reference for a sanity check
    xp = jnp.pad(x_nchw, ((0, 0), (0, 0), (1, 1), (1, 1)))
    v1 = jnp.einsum("nchw,oc->nohw", xp, conv_w.reshape(conv_w.shape[0], -1))
    v1 = v1 + conv_b[None, :, None, None]
    mean = jnp.mean(v1, axis=(0, 2, 3), keepdims=True)
    var = jnp.mean((v1 - mean) ** 2, axis=(0, 2, 3), keepdims=True)
    y = (v1 - mean) * jax.lax.rsqrt(var + EPS)
    y = y * bn_gamma[None, :, None, None] + bn_beta[None, :, None, None]
    return y * y


if __name__ == "__main__":
    key = jax.random.PRNGKey(0)
    k_x, k_w, k_b = jax.random.split(key, 3)

    # Small shapes consistent with the module (Cin=3 required by the conv).
    N, Cin, H, W = 2, 3, 16, 16
    Cout = 8

    x = jax.random.normal(k_x, (N, Cin, H, W), dtype=jnp.float32)

    # Deterministic synthetic parameters (shapes from Conv2d(3, 8, 1) / BN).
    conv_w = 0.1 * jax.random.normal(k_w, (Cout, Cin, 1, 1), dtype=jnp.float32)
    conv_b = 0.1 * jax.random.normal(k_b, (Cout,), dtype=jnp.float32)
    bn_gamma = jnp.ones((Cout,), dtype=jnp.float32)   # PyTorch default init
    bn_beta = jnp.zeros((Cout,), dtype=jnp.float32)   # PyTorch default init

    # Parameter packing happens ONCE here (init time), not per forward.
    params = pack_params(conv_w, conv_b, bn_gamma, bn_beta)

    out = model_forward(x, params)
    out = jax.block_until_ready(out)

    ref = _reference(x, conv_w, conv_b, bn_gamma, bn_beta)
    assert out.shape == (N, Cout, H + 2, W + 2), out.shape
    assert jnp.allclose(out, ref, atol=1e-4, rtol=1e-4), "mismatch vs reference"

    print("KERNEL_OK")
</pallas_src>

<mosaic_0001>
module attributes {stable_mosaic.version = 11 : i64} {
  func.func @conv_bn_square_kernel(%arg0: i32, %arg1: memref<2x3x324xf32, #tpu.memory_space<vmem>>, %arg2: memref<6x8x1xf32, #tpu.memory_space<vmem>>, %arg3: memref<2x8x324xf32, #tpu.memory_space<vmem>>) attributes {dimension_semantics = [#tpu.dimension_semantics<arbitrary>], iteration_bounds = array<i64: 1>, scalar_prefetch = 0 : i64, scratch_operands = 0 : i64, tpu.core_type = #tpu.core_type<tc>, window_params = [{pipeline_mode = #tpu.pipeline_mode<synchronous>, transform_indices = @transform_0, window_bounds = array<i64: 2, 3, 324>}, {pipeline_mode = #tpu.pipeline_mode<synchronous>, transform_indices = @transform_1, window_bounds = array<i64: 6, 8, 1>}, {pipeline_mode = #tpu.pipeline_mode<synchronous>, transform_indices = @transform_2, window_bounds = array<i64: 2, 8, 324>}]} {
    %c3 = arith.constant 3 : index
    %c0 = arith.constant 0 : index
    %c0_0 = arith.constant 0 : index
    %0 = vector.load %arg2[%c3, %c0, %c0_0] : memref<6x8x1xf32, #tpu.memory_space<vmem>>, vector<1x8x1xf32>
    %1 = vector.shape_cast %0 : vector<1x8x1xf32> to vector<8x1xf32>
    %2 = vector.shape_cast %1 : vector<8x1xf32> to vector<1x8x1xf32>
    %c0_1 = arith.constant 0 : index
    %c0_2 = arith.constant 0 : index
    %c0_3 = arith.constant 0 : index
    %3 = vector.load %arg1[%c0_1, %c0_2, %c0_3] : memref<2x3x324xf32, #tpu.memory_space<vmem>>, vector<2x1x324xf32>
    %c0_4 = arith.constant 0 : index
    %c0_5 = arith.constant 0 : index
    %c0_6 = arith.constant 0 : index
    %4 = vector.load %arg2[%c0_4, %c0_5, %c0_6] : memref<6x8x1xf32, #tpu.memory_space<vmem>>, vector<1x8x1xf32>
    %5 = vector.shape_cast %4 : vector<1x8x1xf32> to vector<8x1xf32>
    %6 = vector.shape_cast %5 : vector<8x1xf32> to vector<1x8x1xf32>
    %7 = vector.broadcast %6 : vector<1x8x1xf32> to vector<2x8x324xf32>
    %8 = vector.broadcast %3 : vector<2x1x324xf32> to vector<2x8x324xf32>
    %9 = arith.mulf %7, %8 : vector<2x8x324xf32>
    %10 = vector.broadcast %2 : vector<1x8x1xf32> to vector<2x8x324xf32>
    %11 = arith.addf %10, %9 : vector<2x8x324xf32>
    %c0_7 = arith.constant 0 : index
    %c1 = arith.constant 1 : index
    %c0_8 = arith.constant 0 : index
    %12 = vector.load %arg1[%c0_7, %c1, %c0_8] : memref<2x3x324xf32, #tpu.memory_space<vmem>>, vector<2x1x324xf32>
    %c1_9 = arith.constant 1 : index
    %c0_10 = arith.constant 0 : index
    %c0_11 = arith.constant 0 : index
    %13 = vector.load %arg2[%c1_9, %c0_10, %c0_11] : memref<6x8x1xf32, #tpu.memory_space<vmem>>, vector<1x8x1xf32>
    %14 = vector.shape_cast %13 : vector<1x8x1xf32> to vector<8x1xf32>
    %15 = vector.shape_cast %14 : vector<8x1xf32> to vector<1x8x1xf32>
    %16 = vector.broadcast %15 : vector<1x8x1xf32> to vector<2x8x324xf32>
    %17 = vector.broadcast %12 : vector<2x1x324xf32> to vector<2x8x324xf32>
    %18 = arith.mulf %16, %17 : vector<2x8x324xf32>
    %19 = arith.addf %11, %18 : vector<2x8x324xf32>
    %c0_12 = arith.constant 0 : index
    %c2 = arith.constant 2 : index
    %c0_13 = arith.constant 0 : index
    %20 = vector.load %arg1[%c0_12, %c2, %c0_13] : memref<2x3x324xf32, #tpu.memory_space<vmem>>, vector<2x1x324xf32>
    %c2_14 = arith.constant 2 : index
    %c0_15 = arith.constant 0 : index
    %c0_16 = arith.constant 0 : index
    %21 = vector.load %arg2[%c2_14, %c0_15, %c0_16] : memref<6x8x1xf32, #tpu.memory_space<vmem>>, vector<1x8x1xf32>
    %22 = vector.shape_cast %21 : vector<1x8x1xf32> to vector<8x1xf32>
    %23 = vector.shape_cast %22 : vector<8x1xf32> to vector<1x8x1xf32>
    %24 = vector.broadcast %23 : vector<1x8x1xf32> to vector<2x8x324xf32>
    %25 = vector.broadcast %20 : vector<2x1x324xf32> to vector<2x8x324xf32>
    %26 = arith.mulf %24, %25 : vector<2x8x324xf32>
    %27 = arith.addf %19, %26 : vector<2x8x324xf32>
    %cst = arith.constant dense<0.000000e+00> : vector<2x8xf32>
    %28 = vector.multi_reduction <add>, %27, %cst [2] : vector<2x8x324xf32> to vector<2x8xf32>
    %29 = vector.shape_cast %28 : vector<2x8xf32> to vector<2x8x1xf32>
    %30 = arith.mulf %27, %27 : vector<2x8x324xf32>
    %cst_17 = arith.constant dense<0.000000e+00> : vector<2x8xf32>
    %31 = vector.multi_reduction <add>, %30, %cst_17 [2] : vector<2x8x324xf32> to vector<2x8xf32>
    %32 = vector.shape_cast %31 : vector<2x8xf32> to vector<2x8x1xf32>
    %cst_18 = arith.constant dense<0.000000e+00> : vector<8x1xf32>
    %33 = vector.multi_reduction <add>, %29, %cst_18 [0] : vector<2x8x1xf32> to vector<8x1xf32>
    %34 = vector.shape_cast %33 : vector<8x1xf32> to vector<1x8x1xf32>
    %cst_19 = arith.constant 0.00154320989 : f32
    %35 = vector.broadcast %cst_19 : f32 to vector<1x8x1xf32>
    %36 = arith.mulf %34, %35 : vector<1x8x1xf32>
    %cst_20 = arith.constant dense<0.000000e+00> : vector<8x1xf32>
    %37 = vector.multi_reduction <add>, %32, %cst_20 [0] : vector<2x8x1xf32> to vector<8x1xf32>
    %38 = vector.shape_cast %37 : vector<8x1xf32> to vector<1x8x1xf32>
    %cst_21 = arith.constant 0.00154320989 : f32
    %39 = vector.broadcast %cst_21 : f32 to vector<1x8x1xf32>
    %40 = arith.mulf %38, %39 : vector<1x8x1xf32>
    %41 = arith.mulf %36, %36 : vector<1x8x1xf32>
    %42 = arith.subf %40, %41 : vector<1x8x1xf32>
    %cst_22 = arith.constant 0.000000e+00 : f32
    %43 = vector.broadcast %cst_22 : f32 to vector<1x8x1xf32>
    %44 = arith.maximumf %42, %43 : vector<1x8x1xf32>
    %c4 = arith.constant 4 : index
    %c0_23 = arith.constant 0 : index
    %c0_24 = arith.constant 0 : index
    %45 = vector.load %arg2[%c4, %c0_23, %c0_24] : memref<6x8x1xf32, #tpu.memory_space<vmem>>, vector<1x8x1xf32>
    %46 = vector.shape_cast %45 : vector<1x8x1xf32> to vector<8x1xf32>
    %47 = vector.shape_cast %46 : vector<8x1xf32> to vector<1x8x1xf32>
    %c5 = arith.constant 5 : index
    %c0_25 = arith.constant 0 : index
    %c0_26 = arith.constant 0 : index
    %48 = vector.load %arg2[%c5, %c0_25, %c0_26] : memref<6x8x1xf32, #tpu.memory_space<vmem>>, vector<1x8x1xf32>
    %49 = vector.shape_cast %48 : vector<1x8x1xf32> to vector<8x1xf32>
    %50 = vector.shape_cast %49 : vector<8x1xf32> to vector<1x8x1xf32>
    %cst_27 = arith.constant 5.000000e-01 : f32
    %51 = vector.broadcast %cst_27 : f32 to vector<1x8x1xf32>
    %52 = arith.addf %44, %51 : vector<1x8x1xf32>
    %53 = math.rsqrt %52 : vector<1x8x1xf32>
    %54 = arith.mulf %47, %53 : vector<1x8x1xf32>
    %55 = arith.mulf %36, %54 : vector<1x8x1xf32>
    %56 = arith.subf %50, %55 : vector<1x8x1xf32>
    %57 = vector.broadcast %54 : vector<1x8x1xf32> to vector<2x8x324xf32>
    %58 = arith.mulf %27, %57 : vector<2x8x324xf32>
    %59 = vector.broadcast %56 : vector<1x8x1xf32> to vector<2x8x324xf32>
    %60 = arith.addf %58, %59 : vector<2x8x324xf32>
    %61 = arith.mulf %60, %60 : vector<2x8x324xf32>
    %c0_28 = arith.constant 0 : index
    %c0_29 = arith.constant 0 : index
    %c0_30 = arith.constant 0 : index
    %62 = vector.load %arg3[%c0_28, %c0_29, %c0_30] : memref<2x8x324xf32, #tpu.memory_space<vmem>>, vector<2x8x324xf32>
    tpu.vector_store %arg3[%c0_28, %c0_29, %c0_30], %61 {strides = array<i32>} : memref<2x8x324xf32, #tpu.memory_space<vmem>>, vector<2x8x324xf32>,
    return
  }
  func.func @transform_0(%arg0: i32) -> (i32, i32, i32) {
    %c0_i32 = arith.constant 0 : i32
    %c0_i32_0 = arith.constant 0 : i32
    %c0_i32_1 = arith.constant 0 : i32
    %c0_i32_2 = arith.constant 0 : i32
    return %c0_i32, %c0_i32_0, %c0_i32_1 : i32, i32, i32
  }
  func.func @transform_1(%arg0: i32) -> (i32, i32, i32) {
    %c0_i32 = arith.constant 0 : i32
    %c0_i32_0 = arith.constant 0 : i32
    %c0_i32_1 = arith.constant 0 : i32
    %c0_i32_2 = arith.constant 0 : i32
    return %c0_i32, %c0_i32_0, %c0_i32_1 : i32, i32, i32
  }
  func.func @transform_2(%arg0: i32) -> (i32, i32, i32) {
    %c0_i32 = arith.constant 0 : i32
    %c0_i32_0 = arith.constant 0 : i32
    %c0_i32_1 = arith.constant 0 : i32
    %c0_i32_2 = arith.constant 0 : i32
    return %c0_i32, %c0_i32_0, %c0_i32_1 : i32, i32, i32
  }
}

</mosaic_0001>

<bundles_post_ra>
// kernel: model_forward.1
= control target key start
LH: loop header
LB: loop body
LE: loop exit
PB: predicated region body
PF: predicated region fallthrough
CT: control target
= control target key end

     0   :  { %v277_v0 = vmov 0   ;;  %v24_v5 = vlaneseq  ;;  %vm182_vm0 = vcmask 556032   ;;  %s353_s1 = inlined_call_operand.vmem [shape: f32[6,8,1], index: 1, kind: input, shape index: {}]   ;;  %s354_s0 = inlined_call_operand.vmem [shape: f32[2,3,324], index: 0, kind: input, shape index: {}]   ;;  %s355_s2 = inlined_call_operand.vmem [shape: f32[2,8,324], index: 2, kind: output, shape index: {}]  }
   0x1   :  { %274 = vset.pattern.permute.xlu1 %v277_v0  ;;  %273 = vset.pattern.permute.xlu0 %v277_v0  ;;  %v266_v1 = vld [vmem:[%s353_s1 + $0x8] sm:$0xff]  ;;  %v16_v2 = vld [vmem:[%s353_s1] sm:$0xff]  ;;  %v269_v3 = vld [vmem:[%s353_s1 + $0x10] sm:$0xff] }
   0x2   :  { %79 = vperm.xlu1 %274, %v266_v1   ;;  %19 = vperm.xlu0 %273, %v16_v2   ;;  %v262_v4 = vld [vmem:[%s353_s1 + $0x18] sm:$0xff]  ;;  %v25_v6 = vshrl.u32 %v24_v5, 7  ;;  %v264_v7 = vld [vmem:[%s354_s0 + $0x1] ss:$4 sm:$0x7] }
   0x3   :  { %v265_v10 = vld [vmem:[%s354_s0 + $0xd] ss:$4 sm:$0x7]  ;;  %v13_v12 = vld [vmem:[%s354_s0] ss:$4 sm:$0x7] }
   0x4   :  { %v26_v8 = vsub.s32 0, %v25_v6  ;;  %v30_v9 = vsub.s32 1, %v25_v6  ;;  %v34_v11 = vsub.s32 2, %v25_v6  ;;  %v263_v13 = vld [vmem:[%s354_s0 + $0xc] ss:$4 sm:$0x7] }
   0x5   :  { %v268_v17 = vld [vmem:[%s354_s0 + $0xe] ss:$4 sm:$0x7]  ;;  %v267_v22 = vld [vmem:[%s354_s0 + $0x2] ss:$4 sm:$0x7] }
   0x6   :  { %134 = vperm.xlu1 %274, %v269_v3   ;;  %62 = vperm.xlu0 %273, %v262_v4   ;;  %v87_v14 = vrot.slane %v264_v7, %v26_v8  ;;  %v91_v15 = vrot.slane %v264_v7, %v30_v9  ;;  %v99_v16 = vrot.slane %v265_v10, %v26_v8 }
   0x7   :  { %v103_v18 = vrot.slane %v265_v10, %v30_v9  ;;  %v27_v19 = vrot.slane %v13_v12, %v26_v8  ;;  %v31_v20 = vrot.slane %v13_v12, %v30_v9  ;;  %v35_v21 = vrot.slane %v13_v12, %v34_v11 }
   0x8   :  { %v39_v23 = vrot.slane %v263_v13, %v26_v8  ;;  %v43_v24 = vrot.slane %v263_v13, %v30_v9  ;;  %v47_v25 = vrot.slane %v263_v13, %v34_v11  ;;  %v107_v26 = vrot.slane %v265_v10, %v34_v11 }
   0x9   :  { %v154_v29 = vrot.slane %v268_v17, %v26_v8  ;;  %v158_v30 = vrot.slane %v268_v17, %v30_v9  ;;  %v162_v31 = vrot.slane %v268_v17, %v34_v11  ;;  %v95_v32 = vrot.slane %v264_v7, %v34_v11 }
   0xa   :  { %v142_v33 = vrot.slane %v267_v22, %v26_v8  ;;  %v146_v34 = vrot.slane %v267_v22, %v30_v9  ;;  %v150_v35 = vrot.slane %v267_v22, %v34_v11 }
  0x7d   :  { %v80_v27 = vpop.permute.xlu1 %79  ;;  %v20_v28 = vpop.permute.xlu0 %19 }
  0x7e   :  { %v114_v36 = vmul.f32 %v87_v14, %v80_v27  ;;  %v115_v37 = vmul.f32 %v91_v15, %v80_v27  ;;  %v117_v38 = vmul.f32 %v99_v16, %v80_v27  ;;  %v118_v39 = vmul.f32 %v103_v18, %v80_v27 }
  0x7f   :  { %v54_v40 = vmul.f32 %v27_v19, %v20_v28  ;;  %v55_v41 = vmul.f32 %v31_v20, %v20_v28  ;;  %v57_v42 = vmul.f32 %v39_v23, %v20_v28  ;;  %v58_v43 = vmul.f32 %v43_v24, %v20_v28 }
  0x80   :  { %v56_v44 = vmul.f32 %v35_v21, %v20_v28  ;;  %v59_v45 = vmul.f32 %v47_v25, %v20_v28  ;;  %v119_v48 = vmul.f32 %v107_v26, %v80_v27  ;;  %v116_v49 = vmul.f32 %v95_v32, %v80_v27 }
  0x81   :  { %v135_v46 = vpop.permute.xlu1 %134  ;;  %v63_v47 = vpop.permute.xlu0 %62 }
  0x82   :  { %v65_v50 = vadd.f32 %v63_v47, %v54_v40  ;;  %v66_v51 = vadd.f32 %v63_v47, %v55_v41  ;;  %v68_v52 = vadd.f32 %v63_v47, %v57_v42  ;;  %v69_v53 = vadd.f32 %v63_v47, %v58_v43  ;;  %v270_v40 = vld [vmem:[%s353_s1 + $0x20] sm:$0xff]  ;;  %v271_v43 = vld [vmem:[%s353_s1 + $0x28] sm:$0xff] }
  0x83   :  { %v70_v54 = vadd.f32 %v63_v47, %v59_v45  ;;  %v172_v55 = vmul.f32 %v154_v29, %v135_v46  ;;  %v173_v56 = vmul.f32 %v158_v30, %v135_v46  ;;  %v174_v57 = vmul.f32 %v162_v31, %v135_v46 }
  0x84   :  { %v123_v58 = vadd.f32 %v117_v38, %v68_v52  ;;  %v124_v59 = vadd.f32 %v118_v39, %v69_v53  ;;  %v67_v60 = vadd.f32 %v63_v47, %v56_v44  ;;  %v120_v61 = vadd.f32 %v114_v36, %v65_v50 }
  0x85   :  { %v125_v62 = vadd.f32 %v119_v48, %v70_v54  ;;  %v121_v63 = vadd.f32 %v115_v37, %v66_v51  ;;  %v169_v0 = vmul.f32 %v142_v33, %v135_v46  ;;  %v170_v1 = vmul.f32 %v146_v34, %v135_v46 }
  0x86   :  { %v178_v2 = vadd.f32 %v172_v55, %v123_v58  ;;  %v179_v3 = vadd.f32 %v173_v56, %v124_v59  ;;  %v122_v4 = vadd.f32 %v116_v49, %v67_v60  ;;  %v171_v5 = vmul.f32 %v150_v35, %v135_v46 }
  0x87   :  { %v180_v6 = vadd.f32 %v174_v57, %v125_v62  ;;  %v175_v7 = vadd.f32 %v169_v0, %v120_v61  ;;  %v176_v8 = vadd.f32 %v170_v1, %v121_v63 }
  0x88   :  { %v187_v9 = vadd.f32 %v179_v3, %v178_v2  ;;  %v177_v10 = vadd.f32 %v171_v5, %v122_v4  ;;  %v195_v20 = vmul.f32 %v178_v2, %v178_v2  ;;  %v196_v21 = vmul.f32 %v179_v3, %v179_v3 }
  0x89   :  { %v188_v11 = vsel %vm182_vm0, %v180_v6, 0.0  ;;  %v181_v12 = vadd.f32 %v176_v8, %v175_v7  ;;  %v192_v13 = vmul.f32 %v175_v7, %v175_v7  ;;  %v193_v14 = vmul.f32 %v176_v8, %v176_v8 }
  0x8a   :  { %v189_v15 = vadd.f32 %v188_v11, %v187_v9  ;;  %v183_v16 = vsel %vm182_vm0, %v177_v10, 0.0  ;;  %v194_v17 = vmul.f32 %v177_v10, %v177_v10  ;;  %v197_v23 = vmul.f32 %v180_v6, %v180_v6 }
  0x8b   :  { %v184_v18 = vadd.f32 %v183_v16, %v181_v12  ;;  %v198_v19 = vadd.f32 %v193_v14, %v192_v13  ;;  %v203_v25 = vadd.f32 %v196_v21, %v195_v20 }
  0x8c   :  { %190 = vadd.xlane.f32.xlu1 %v189_v15  ;;  %v199_v22 = vsel %vm182_vm0, %v194_v17, 0.0  ;;  %v204_v26 = vsel %vm182_vm0, %v197_v23, 0.0 }
  0x8d   :  { %185 = vadd.xlane.f32.xlu0 %v184_v18  ;;  %v200_v24 = vadd.f32 %v199_v22, %v198_v19  ;;  %v205_v27 = vadd.f32 %v204_v26, %v203_v25 }
  0x91   :  { %201 = vadd.xlane.f32.xlu0 %v200_v24 }
  0x95   :  { %206 = vadd.xlane.f32.xlu0 %v205_v27 }
 0x115   :  { %v191_v28 = vpop.xlane.xlu1 %190 }
 0x116   :  { %v186_v29 = vpop.xlane.xlu0 %185 }
 0x117   :  { %v208_v30 = vadd.f32 %v191_v28, %v186_v29 }
 0x119   :  { %v209_v32 = vmul.f32 0.0015432099, %v208_v30 }
 0x11a   :  { %v202_v31 = vpop.xlane.xlu0 %201 }
 0x11b   :  { %v212_v35 = vmul.f32 %v209_v32, %v209_v32 }
 0x11e   :  { %v207_v33 = vpop.xlane.xlu0 %206 }
 0x11f   :  { %v210_v34 = vadd.f32 %v207_v33, %v202_v31 }
 0x121   :  { %v211_v36 = vmul.f32 0.0015432099, %v210_v34 }
 0x123   :  { %v213_v37 = vsub.f32 %v211_v36, %v212_v35 }
 0x125   :  { %v214_v38 = vmax.f32 %v213_v37, 0.0 }
 0x127   :  { %v219_v39 = vadd.f32 0.5, %v214_v38 }
 0x129   :  { %275 = vrsqrt.f32 %v219_v39 }
 0x136   :  { %v276_v41 = vpop.eup %275 }
 0x137   :  { %v221_v42 = vmul.f32 %v276_v41, %v270_v40 }
 0x139   :  { %226 = vperm.xlu1 %274, %v221_v42   ;;  %v222_v44 = vmul.f32 %v221_v42, %v209_v32 }
 0x13b   :  { %v223_v45 = vsub.f32 %v271_v43, %v222_v44 }
 0x13d   :  { %237 = vperm.xlu0 %273, %v223_v45  }
 0x1b4   :  { %v227_v46 = vpop.permute.xlu1 %226 }
 0x1b5   :  { %v229_v47 = vmul.f32 %v227_v46, %v175_v7  ;;  %v230_v48 = vmul.f32 %v227_v46, %v176_v8  ;;  %v231_v49 = vmul.f32 %v227_v46, %v177_v10  ;;  %v232_v50 = vmul.f32 %v227_v46, %v178_v2 }
 0x1b6   :  { %v233_v51 = vmul.f32 %v227_v46, %v179_v3  ;;  %v234_v52 = vmul.f32 %v227_v46, %v180_v6 }
 0x1b8   :  { %v238_v53 = vpop.permute.xlu0 %237 }
 0x1b9   :  { %v240_v54 = vadd.f32 %v238_v53, %v229_v47  ;;  %v241_v55 = vadd.f32 %v238_v53, %v230_v48  ;;  %v242_v56 = vadd.f32 %v238_v53, %v231_v49  ;;  %v243_v57 = vadd.f32 %v238_v53, %v232_v50 }
 0x1ba   :  { %v244_v58 = vadd.f32 %v238_v53, %v233_v51  ;;  %v245_v59 = vadd.f32 %v238_v53, %v234_v52 }
 0x1bb   :  { %v246_v60 = vmul.f32 %v240_v54, %v240_v54  ;;  %v247_v61 = vmul.f32 %v241_v55, %v241_v55  ;;  %v248_v62 = vmul.f32 %v242_v56, %v242_v56  ;;  %v249_v63 = vmul.f32 %v243_v57, %v243_v57 }
 0x1bc   :  { %v250_v0 = vmul.f32 %v244_v58, %v244_v58  ;;  %v251_v1 = vmul.f32 %v245_v59, %v245_v59 }
 0x1bd   :  { %252 = vst [vmem:[%s355_s2] sm:$0xff] %v246_v60  ;;  %253 = vst [vmem:[%s355_s2 + $0x8] sm:$0xff] %v247_v61 }
 0x1be   :  { %254 = vst.msk [vmem:[%s355_s2 + $0x10] sm:$0xff] %vm182_vm0, %v248_v62  ;;  %255 = vst [vmem:[%s355_s2 + $0x18] sm:$0xff] %v249_v63 }
 0x1bf   :  { %256 = vst [vmem:[%s355_s2 + $0x20] sm:$0xff] %v250_v0  ;;  %257 = vst.msk [vmem:[%s355_s2 + $0x28] sm:$0xff] %vm182_vm0, %v251_v1 }

</bundles_post_ra>
